<compile_context>
chip_gen: v5e
topology: v5e:2x2
jax: 0.10.0
libtpu: 0.0.40
codegen_flags: <defaults>
</compile_context>

<pallas_src>
import jax
import jax.numpy as jnp
from jax.experimental import pallas as pl
from jax.experimental.pallas import tpu as pltpu
import numpy as np


def _round_up(x, m):
    return ((x + m - 1) // m) * m


def _stats_kernel(e_ref, m_ref, expand_ref, sum_ref, ssq_ref):
    """Masked per-channel sum / sum-of-squares, kept as (8, W) sublane partials."""
    @pl.when(pl.program_id(1) == 0)
    def _():
        sum_ref[...] = jnp.zeros_like(sum_ref)
        ssq_ref[...] = jnp.zeros_like(ssq_ref)

    e = e_ref[...].astype(jnp.float32)                       # (TR, W)
    # Lane-expand compact per-row mask (TR, F) -> (TR, W) via one-hot matmul (MXU).
    m = jnp.dot(m_ref[...], expand_ref[...], preferred_element_type=jnp.float32)
    em = e * m
    tr = e.shape[0]
    # (TR, W) -> (TR//8, 8, W) is a sublane-major split; axis-0 sum is pure vreg adds.
    sum_ref[...] += jnp.sum(em.reshape(tr // 8, 8, -1), axis=0)
    ssq_ref[...] += jnp.sum((em * e).reshape(tr // 8, 8, -1), axis=0)


def _apply_kernel(e_ref, m_ref, expand_ref, scale_ref, shift_ref, o_ref):
    """out = where(square_mask, e * scale + shift, e), lane-dense, written in e.dtype."""
    e = e_ref[...].astype(jnp.float32)                       # (TR, W)
    m = jnp.dot(m_ref[...], expand_ref[...], preferred_element_type=jnp.float32)
    y = e * scale_ref[...] + shift_ref[...]                  # (1, W) broadcasts
    o_ref[...] = jnp.where(m > 0, y, e).astype(o_ref.dtype)


def _pick_tiling(R, F, tile_rows):
    """Choose (tile_rf, n_tiles, P, T, RF_pad), preferring zero padding (pad copies e)."""
    RF = -(-R // F)                                          # folded rows (ceil)
    RF8 = _round_up(max(RF, 8), 8)
    desired = max(8, min(_round_up(tile_rows, 8), RF8))      # multiple of 8

    if (R % F == 0) and (RF % 8 == 0):
        # Look for a multiple-of-8 divisor of RF in [lo, desired]: exact cover, no pad.
        lo = max(8, min(RF, 256))
        t = desired
        while t >= lo:
            if RF % t == 0:
                n_tiles = RF // t
                P = 2 if (n_tiles >= 2 and n_tiles % 2 == 0) else 1
                return t, n_tiles, P, n_tiles // P, RF
            t -= 8
    # Fallback: pad folded rows up to a whole (even when >=2) number of tiles.
    tile_rf = desired
    n_tiles = -(-RF // tile_rf)
    P = 2 if n_tiles >= 2 else 1
    T = -(-n_tiles // P)
    n_tiles = P * T
    return tile_rf, n_tiles, P, T, n_tiles * tile_rf


def batch_norm_edge(e, mask, gamma, beta, eps=1e-5, tile_rows=2048):
    """e: (B, N, N, H); mask: (B, N); gamma/beta: (H,). Matches BatchNormEdge.forward."""
    B, N, N2, H = e.shape
    assert N == N2
    R = B * N * N
    out_dtype = e.dtype

    # Lane-dense folding factor: pack F consecutive edge rows into the 128-lane axis.
    if H < 128 and 128 % H == 0:
        F = 128 // H
    else:
        F = 1
    W = F * H

    tile_rf, n_tiles, P, T, RF_pad = _pick_tiling(R, F, tile_rows)
    R_pad = RF_pad * F

    e_flat = e.reshape(R, H)                                 # metadata-only reshape
    nz = (mask != 0)
    msq = (nz[:, :, None] & nz[:, None, :]).astype(jnp.float32).reshape(R)
    if R_pad != R:                                           # zero-mask rows: stats-neutral
        e_flat = jnp.pad(e_flat, ((0, R_pad - R), (0, 0)))
        msq = jnp.pad(msq, (0, R_pad - R))
    e_fold = e_flat.reshape(RF_pad, W)
    m_fold = msq.reshape(RF_pad, F)

    # One-hot lane-expansion matrix: expand[f, f*H + c] = 1.
    expand = (jnp.arange(W)[None, :] // H == jnp.arange(F)[:, None]).astype(jnp.float32)

    vmem_limit = 32 * 1024 * 1024

    # ---- pass 1: masked per-channel statistics (P independent partial accumulators) ----
    sum_p, ssq_p = pl.pallas_call(
        _stats_kernel,
        out_shape=(jax.ShapeDtypeStruct((P * 8, W), jnp.float32),
                   jax.ShapeDtypeStruct((P * 8, W), jnp.float32)),
        grid=(P, T),
        in_specs=[
            pl.BlockSpec((tile_rf, W), lambda p, t: (p * T + t, 0)),
            pl.BlockSpec((tile_rf, F), lambda p, t: (p * T + t, 0)),
            pl.BlockSpec((F, W), lambda p, t: (0, 0)),
        ],
        out_specs=(pl.BlockSpec((8, W), lambda p, t: (p, 0)),
                   pl.BlockSpec((8, W), lambda p, t: (p, 0))),
        compiler_params=pltpu.CompilerParams(
            dimension_semantics=("parallel", "arbitrary"),
            vmem_limit_bytes=vmem_limit),
    )(e_fold, m_fold, expand)

    # ---- tiny epilogue: collapse partials, build per-channel scale/shift ----
    s = jnp.sum(sum_p.reshape(-1, F, H), axis=(0, 1))        # (H,)
    ss = jnp.sum(ssq_p.reshape(-1, F, H), axis=(0, 1))       # (H,)
    nnz_per_b = jnp.sum(nz.astype(jnp.float32), axis=1)
    cnt = jnp.maximum(jnp.sum(nnz_per_b * nnz_per_b), 1.0)   # |{(b,i,j): square_mask}|
    mean = s / cnt
    var = jnp.maximum(ss / cnt - mean * mean, 0.0)           # guard f32 cancellation
    inv_std = jax.lax.rsqrt(var + eps)
    scale_h = gamma.astype(jnp.float32) * inv_std
    shift_h = beta.astype(jnp.float32) - mean * scale_h
    scale = jnp.tile(scale_h, F).reshape(1, W)
    shift = jnp.tile(shift_h, F).reshape(1, W)

    # ---- pass 2: masked affine normalization ----
    out_fold = pl.pallas_call(
        _apply_kernel,
        out_shape=jax.ShapeDtypeStruct((RF_pad, W), out_dtype),
        grid=(n_tiles,),
        in_specs=[
            pl.BlockSpec((tile_rf, W), lambda i: (i, 0)),
            pl.BlockSpec((tile_rf, F), lambda i: (i, 0)),
            pl.BlockSpec((F, W), lambda i: (0, 0)),
            pl.BlockSpec((1, W), lambda i: (0, 0)),
            pl.BlockSpec((1, W), lambda i: (0, 0)),
        ],
        out_specs=pl.BlockSpec((tile_rf, W), lambda i: (i, 0)),
        compiler_params=pltpu.CompilerParams(
            dimension_semantics=("parallel",),
            vmem_limit_bytes=vmem_limit),
    )(e_fold, m_fold, expand, scale, shift)

    out_flat = out_fold.reshape(R_pad, H)
    if R_pad != R:
        out_flat = out_flat[:R]
    return out_flat.reshape(B, N, N, H)


def _reference(e, mask, gamma, beta, eps=1e-5):
    """Pure-JAX reference of the PyTorch forward (masked BatchNorm1d, batch stats)."""
    nz = (mask != 0)
    msq = (nz[:, :, None] & nz[:, None, :]).astype(jnp.float32)[..., None]  # (B,N,N,1)
    cnt = jnp.maximum(jnp.sum(msq), 1.0)
    mean = jnp.sum(e * msq, axis=(0, 1, 2)) / cnt
    var = jnp.sum((e * msq) * e, axis=(0, 1, 2)) / cnt - mean * mean
    y = (e - mean) * jax.lax.rsqrt(var + eps) * gamma + beta
    return jnp.where(msq > 0, y, e)


if __name__ == "__main__":
    key = jax.random.PRNGKey(0)
    k_e, k_e2 = jax.random.split(key)

    # BatchNorm1d affine params (PyTorch default is ones/zeros; made nontrivial here).
    H = 32
    gamma = 1.0 + 0.05 * jnp.arange(H, dtype=jnp.float32)
    beta = 0.02 * jnp.arange(H, dtype=jnp.float32)

    # --- test 1: standard small shape, single-tile, no-padding path ---
    B, N = 2, 8
    e = jax.random.normal(k_e, (B, N, N, H), dtype=jnp.float32)
    num_valid = jnp.array([6, 5], dtype=jnp.int32)
    mask = (jnp.arange(N)[None, :] < num_valid[:, None]).astype(jnp.float32)  # (B, N)

    out = jax.block_until_ready(batch_norm_edge(e, mask, gamma, beta))
    ref = jax.block_until_ready(_reference(e, mask, gamma, beta))
    np.testing.assert_allclose(np.asarray(out), np.asarray(ref), rtol=1e-5, atol=1e-5)

    # --- test 2: same data, forced multi-tile exact-divisor path (P=2, no padding) ---
    out_b = jax.block_until_ready(batch_norm_edge(e, mask, gamma, beta, tile_rows=16))
    np.testing.assert_allclose(np.asarray(out_b), np.asarray(ref), rtol=1e-5, atol=1e-5)

    # --- test 3: ragged shape -> exercises zero-mask padding fallback, multi-tile
    #             accumulation and the (parallel, arbitrary) partial-sum grid ---
    B2, N2 = 2, 7
    e2 = jax.random.normal(k_e2, (B2, N2, N2, H), dtype=jnp.float32)
    mask2 = (jnp.arange(N2)[None, :] < jnp.array([5, 4])[:, None]).astype(jnp.float32)
    out2 = jax.block_until_ready(batch_norm_edge(e2, mask2, gamma, beta, tile_rows=8))
    ref2 = jax.block_until_ready(_reference(e2, mask2, gamma, beta))
    np.testing.assert_allclose(np.asarray(out2), np.asarray(ref2), rtol=1e-5, atol=1e-5)

    print("KERNEL_OK")
</pallas_src>

<mosaic_0001>
module attributes {stable_mosaic.version = 11 : i64} {
  func.func @_stats_kernel(%arg0: i32, %arg1: i32, %arg2: memref<32x128xf32, #tpu.memory_space<vmem>>, %arg3: memref<32x4xf32, #tpu.memory_space<vmem>>, %arg4: memref<4x128xf32, #tpu.memory_space<vmem>>, %arg5: memref<8x128xf32, #tpu.memory_space<vmem>>, %arg6: memref<8x128xf32, #tpu.memory_space<vmem>>) attributes {dimension_semantics = [#tpu.dimension_semantics<parallel>, #tpu.dimension_semantics<arbitrary>], iteration_bounds = array<i64: 1, 1>, scalar_prefetch = 0 : i64, scratch_operands = 0 : i64, tpu.core_type = #tpu.core_type<tc>, window_params = [{transform_indices = @transform_0, window_bounds = array<i64: 32, 128>}, {transform_indices = @transform_1, window_bounds = array<i64: 32, 4>}, {pipeline_mode = #tpu.pipeline_mode<synchronous>, transform_indices = @transform_2, window_bounds = array<i64: 4, 128>}, {transform_indices = @transform_3, window_bounds = array<i64: 8, 128>}, {transform_indices = @transform_4, window_bounds = array<i64: 8, 128>}]} {
    %c0_i32 = arith.constant 0 : i32
    %0 = arith.cmpi eq, %arg1, %c0_i32 : i32
    %1 = arith.extui %0 : i1 to i32
    %c0_i32_0 = arith.constant 0 : i32
    %2 = arith.cmpi ne, %1, %c0_i32_0 : i32
    scf.if %2 {
      %cst_16 = arith.constant 0.000000e+00 : f32
      %19 = vector.broadcast %cst_16 : f32 to vector<8x128xf32>
      %c0_17 = arith.constant 0 : index
      %c0_18 = arith.constant 0 : index
      %20 = vector.load %arg5[%c0_17, %c0_18] : memref<8x128xf32, #tpu.memory_space<vmem>>, vector<8x128xf32>
      tpu.vector_store %arg5[%c0_17, %c0_18], %19 {strides = array<i32>} : memref<8x128xf32, #tpu.memory_space<vmem>>, vector<8x128xf32>,
      %cst_19 = arith.constant 0.000000e+00 : f32
      %21 = vector.broadcast %cst_19 : f32 to vector<8x128xf32>
      %c0_20 = arith.constant 0 : index
      %c0_21 = arith.constant 0 : index
      %22 = vector.load %arg6[%c0_20, %c0_21] : memref<8x128xf32, #tpu.memory_space<vmem>>, vector<8x128xf32>
      tpu.vector_store %arg6[%c0_20, %c0_21], %21 {strides = array<i32>} : memref<8x128xf32, #tpu.memory_space<vmem>>, vector<8x128xf32>,
    } else {
    }
    %c0 = arith.constant 0 : index
    %c0_1 = arith.constant 0 : index
    %3 = vector.load %arg2[%c0, %c0_1] : memref<32x128xf32, #tpu.memory_space<vmem>>, vector<32x128xf32>
    %c0_2 = arith.constant 0 : index
    %c0_3 = arith.constant 0 : index
    %4 = vector.load %arg3[%c0_2, %c0_3] : memref<32x4xf32, #tpu.memory_space<vmem>>, vector<32x4xf32>
    %c0_4 = arith.constant 0 : index
    %c0_5 = arith.constant 0 : index
    %5 = vector.load %arg4[%c0_4, %c0_5] : memref<4x128xf32, #tpu.memory_space<vmem>>, vector<4x128xf32>
    %cst = arith.constant dense<0.000000e+00> : vector<32x128xf32>
    %6 = tpu.matmul %4, %5, %cst {dimension_numbers = #tpu.dot_dimension_numbers<[1], [0], [0], [1], [0, 0, 1, 1], [], []>} : vector<32x4xf32>, vector<4x128xf32>, vector<32x128xf32> -> vector<32x128xf32>
    %7 = arith.mulf %3, %6 : vector<32x128xf32>
    %c0_6 = arith.constant 0 : index
    %c0_7 = arith.constant 0 : index
    %8 = vector.load %arg5[%c0_6, %c0_7] : memref<8x128xf32, #tpu.memory_space<vmem>>, vector<8x128xf32>
    %9 = vector.shape_cast %7 : vector<32x128xf32> to vector<4x8x128xf32>
    %cst_8 = arith.constant dense<0.000000e+00> : vector<8x128xf32>
    %10 = vector.multi_reduction <add>, %9, %cst_8 [0] : vector<4x8x128xf32> to vector<8x128xf32>
    %11 = arith.addf %8, %10 : vector<8x128xf32>
    %c0_9 = arith.constant 0 : index
    %c0_10 = arith.constant 0 : index
    %12 = vector.load %arg5[%c0_9, %c0_10] : memref<8x128xf32, #tpu.memory_space<vmem>>, vector<8x128xf32>
    tpu.vector_store %arg5[%c0_9, %c0_10], %11 {strides = array<i32>} : memref<8x128xf32, #tpu.memory_space<vmem>>, vector<8x128xf32>,
    %c0_11 = arith.constant 0 : index
    %c0_12 = arith.constant 0 : index
    %13 = vector.load %arg6[%c0_11, %c0_12] : memref<8x128xf32, #tpu.memory_space<vmem>>, vector<8x128xf32>
    %14 = arith.mulf %7, %3 : vector<32x128xf32>
    %15 = vector.shape_cast %14 : vector<32x128xf32> to vector<4x8x128xf32>
    %cst_13 = arith.constant dense<0.000000e+00> : vector<8x128xf32>
    %16 = vector.multi_reduction <add>, %15, %cst_13 [0] : vector<4x8x128xf32> to vector<8x128xf32>
    %17 = arith.addf %13, %16 : vector<8x128xf32>
    %c0_14 = arith.constant 0 : index
    %c0_15 = arith.constant 0 : index
    %18 = vector.load %arg6[%c0_14, %c0_15] : memref<8x128xf32, #tpu.memory_space<vmem>>, vector<8x128xf32>
    tpu.vector_store %arg6[%c0_14, %c0_15], %17 {strides = array<i32>} : memref<8x128xf32, #tpu.memory_space<vmem>>, vector<8x128xf32>,
    return
  }
  func.func @transform_0(%arg0: i32, %arg1: i32) -> (i32, i32) {
    %c1_i32 = arith.constant 1 : i32
    %0 = arith.muli %arg0, %c1_i32 : i32
    %1 = arith.addi %0, %arg1 : i32
    %c0_i32 = arith.constant 0 : i32
    %c0_i32_0 = arith.constant 0 : i32
    return %1, %c0_i32 : i32, i32
  }
  func.func @transform_1(%arg0: i32, %arg1: i32) -> (i32, i32) {
    %c1_i32 = arith.constant 1 : i32
    %0 = arith.muli %arg0, %c1_i32 : i32
    %1 = arith.addi %0, %arg1 : i32
    %c0_i32 = arith.constant 0 : i32
    %c0_i32_0 = arith.constant 0 : i32
    return %1, %c0_i32 : i32, i32
  }
  func.func @transform_2(%arg0: i32, %arg1: i32) -> (i32, i32) {
    %c0_i32 = arith.constant 0 : i32
    %c0_i32_0 = arith.constant 0 : i32
    %c0_i32_1 = arith.constant 0 : i32
    return %c0_i32, %c0_i32_0 : i32, i32
  }
  func.func @transform_3(%arg0: i32, %arg1: i32) -> (i32, i32) {
    %c0_i32 = arith.constant 0 : i32
    %c0_i32_0 = arith.constant 0 : i32
    return %arg0, %c0_i32 : i32, i32
  }
  func.func @transform_4(%arg0: i32, %arg1: i32) -> (i32, i32) {
    %c0_i32 = arith.constant 0 : i32
    %c0_i32_0 = arith.constant 0 : i32
    return %arg0, %c0_i32 : i32, i32
  }
}

</mosaic_0001>

<bundles_post_ra>
// kernel: tpu_custom_call.1
= control target key start
LH: loop header
LB: loop body
LE: loop exit
PB: predicated region body
PF: predicated region fallthrough
CT: control target
= control target key end

     0   :  { %10 = vsyncpa [#allocation3], 0  ;;  %vm90_vm0 = vcmask 1043456   ;;  %vm77_vm1 = vcmask 31744   ;;  %s310_s0 = inlined_call_operand.vmem [shape: f32[32,128], index: 0, kind: input, shape index: {}]   ;;  %s311_s1 = inlined_call_operand.vmem [shape: f32[32,4], index: 1, kind: input, shape index: {}]   ;;  %s312_s2 = inlined_call_operand.vmem [shape: f32[4,128], index: 2, kind: input, shape index: {}]   ;;  %s313_s3 = inlined_call_operand.hbm [shape: f32[8,128], index: 3, kind: output, shape index: {0}]   ;;  %s314_s4 = inlined_call_operand.hbm [shape: f32[8,128], index: 4, kind: output, shape index: {1}]  }
   0x1   :  { %v76_v0 = vld [vmem:[%s312_s2] sm:$0xf]  ;;  %v74_v1 = vld [vmem:[%s311_s1 + $0x10] sm:$0xff]  ;;  %v75_v2 = vld [vmem:[%s311_s1 + $0x18] sm:$0xff] }
   0x2   :  { %193 = vmatpush.msk.msra.mxu2 %vm90_vm0, %v76_v0  ;;  %194 = vmatpush.msk.msra.mxu3 %vm90_vm0, %v76_v0  ;;  %v72_v3 = vld [vmem:[%s311_s1] sm:$0xff]  ;;  %v73_v4 = vld [vmem:[%s311_s1 + $0x8] sm:$0xff] }
   0x3   :  { %190 = vmatmul.msk.f32.vlgmr.msra.gmra.mxu2 %vm77_vm1, %v74_v1  ;;  %191 = vmatmul.msk.f32.vlgmr.msra.gmra.mxu3 %vm77_vm1, %v75_v2 }
   0x4   :  { %11 = vsyncpa [#allocation5], 0  ;;  %187 = vmatpush.msk.msra.mxu0 %vm90_vm0, %v76_v0  ;;  %192 = vmatpush.msk.msra.mxu1 %vm90_vm0, %v76_v0  ;;  %v68_v5 = vld [vmem:[%s310_s0] sm:$0xff]  ;;  %v69_v6 = vld [vmem:[%s310_s0 + $0x8] sm:$0xff]  ;;  %s250_s5 = smov [#allocation2]   ;;  %s150_s9 = sshll.u32 %s313_s3, 4  ;;  %s151_s9 = int_to_ptr.hbm [resolvable:$true] %s150_s9 }
   0x5   :  { %188 = vmatmul.msk.f32.vlgmr.msra.gmra.mxu0 %vm77_vm1, %v72_v3  ;;  %189 = vmatmul.msk.f32.vlgmr.msra.gmra.mxu1 %vm77_vm1, %v73_v4  ;;  %v70_v11 = vld [vmem:[%s310_s0 + $0x10] sm:$0xff]  ;;  %v71_v12 = vld [vmem:[%s310_s0 + $0x18] sm:$0xff]  ;;  %s148_s6 = sshll.u32 %s250_s5, 4  ;;  %s251_s0 = smov [#allocation4]   ;;  %s149_s6 = int_to_ptr.vmem [resolvable:$true] %s148_s6 }
   0x6   :  { %s159_s10 = sshll.u32 %s251_s0, 4  ;;  %s161_s13 = sshll.u32 %s314_s4, 4  ;;  %s160_s10 = int_to_ptr.vmem [resolvable:$true] %s159_s10  ;;  %s162_s13 = int_to_ptr.hbm [resolvable:$true] %s161_s13 }
  0x82   :  { %v111_v7 = vpop.f32.mrf.mxu0  ;;  %v114_v8 = vpop.f32.mrf.mxu1 }
  0x83   :  { %v123_v9 = vmul.f32 %v111_v7, %v68_v5  ;;  %v124_v10 = vmul.f32 %v114_v8, %v69_v6 }
  0x85   :  { %v134_v13 = vmul.f32 %v123_v9, %v68_v5  ;;  %v128_v14 = vadd.f32 %v124_v10, %v123_v9  ;;  %v135_v15 = vmul.f32 %v124_v10, %v69_v6 }
  0x86   :  { %v117_v16 = vpop.f32.mrf.mxu2  ;;  %v120_v17 = vpop.f32.mrf.mxu3 }
  0x87   :  { %v138_v18 = vadd.f32 %v135_v15, %v134_v13  ;;  %v125_v19 = vmul.f32 %v117_v16, %v70_v11  ;;  %v126_v20 = vmul.f32 %v120_v17, %v71_v12 }
  0x89   :  { %v129_v21 = vadd.f32 %v128_v14, %v125_v19  ;;  %v136_v22 = vmul.f32 %v125_v19, %v70_v11  ;;  %v137_v23 = vmul.f32 %v126_v20, %v71_v12 }
  0x8b   :  { %v139_v24 = vadd.f32 %v138_v18, %v136_v22  ;;  %v130_v25 = vadd.f32 %v129_v21, %v126_v20 }
  0x8d   :  { %v140_v26 = vadd.f32 %v139_v24, %v137_v23  ;;  %132 = vst [vmem:[#allocation2] sm:$0xff] %v130_v25 }
  0x8e   :  { %153 = dma.vmem_to_hbm [thread:$0]  %s149_s6, 128, %s151_s9, [#allocation3]  }
  0x8f   :  { %142 = vst [vmem:[#allocation4] sm:$0xff] %v140_v26 }
  0x90   :  { %164 = dma.vmem_to_hbm [thread:$0]  %s160_s10, 128, %s162_s13, [#allocation5]  }
  0x91   :  { %246 = dma.done.wait [#allocation3], 128  }
  0x92   :  { %247 = vsyncadd [#allocation3], 4294967168 }
  0x93   :  { %248 = dma.done.wait [#allocation5], 128  }
  0x94   :  { %249 = vsyncadd [#allocation5], 4294967168 }
  0x95   :  { %173 = vsyncpa [#allocation3], 1 }
  0x96   :  { %174 = vsyncpa [#allocation5], 1 }

</bundles_post_ra>
